<compile_context>
chip_gen: v7x
topology: tpu7x:2x2x1
jax: 0.10.0
libtpu: 0.0.40
codegen_flags: <defaults>
</compile_context>

<pallas_src>
import jax
import jax.numpy as jnp
from jax.experimental import pallas as pl
from jax.experimental.pallas import tpu as pltpu


def modified_softmax_kernel(x_ref, o_ref):
    # x_ref, o_ref: (TB, C, T) tiles in VMEM. Reduction / softmax axis is C (sublanes).
    x = x_ref[...].astype(jnp.float32)
    c = x.shape[1]

    # norm(axis=1): unbiased std (torch.std default uses N-1).
    # TODO(synk): C == 1 gives a 0/0 in the unbiased variance (matches torch NaN behavior).
    mean = jnp.mean(x, axis=1, keepdims=True)                      # (TB, 1, T)
    var = jnp.sum((x - mean) ** 2, axis=1, keepdims=True) * (1.0 / (c - 1))
    std = jnp.sqrt(var)

    # softmax(8 * (x - mean) / (std + eps), axis=1):
    # the per-column constant 8*mean/(std+eps) cancels inside the softmax, so only the
    # scale survives. scale > 0, so max(scale*x) = scale*max(x) and we can keep the
    # numerically-stable shift in terms of x directly.
    scale = 8.0 * pl.reciprocal(std + 1e-6, approx=False)          # (TB, 1, T), exact
    mx = jnp.max(x, axis=1, keepdims=True)                         # (TB, 1, T)
    e = jnp.exp(scale * (x - mx))                                  # (TB, C, T)
    inv_denom = pl.reciprocal(jnp.sum(e, axis=1, keepdims=True), approx=False)
    o_ref[...] = (e * inv_denom).astype(o_ref.dtype)


def _pick_lane_tile(hw, c):
    """Lane-tile T: multiple of 128 (or full H*W), block bytes <= ~3 MiB so that
    double-buffered in+out (4x) stays under ~12 MiB (safe for the v5e 16 MiB default,
    with plenty of headroom on v6e/v7x)."""
    max_block_bytes = 3 * 1024 * 1024
    max_t = max(128, (max_block_bytes // (c * 4)) // 128 * 128)
    max_t = min(max_t, 8192)
    if hw <= max_t:
        return hw                      # full extent: always legal, lane-dense enough
    # prefer a multiple of 128 that divides hw exactly (no ragged tail)
    for t in range(max_t, 127, -128):
        if hw % t == 0:
            return t
    # ragged tail: columns are independent, Pallas masks the partial writeback
    return max_t


def _largest_divisor_le(n, cap):
    cap = max(1, min(cap, n))
    for d in range(cap, 0, -1):
        if n % d == 0:
            return d
    return 1


def modified_softmax(x):
    """x: (B, C, H, W) float32; norm + *8 + softmax along axis=1 (channels)."""
    B, C, H, W = x.shape
    HW = H * W
    xf = x.reshape(B, C, HW)

    T = _pick_lane_tile(HW, C)
    # Fuse batch elements per grid step when the per-sample tile is tiny (amortize the
    # ~0.35us per-step overhead); keep the fused block around ~1 MiB.
    per_sample_bytes = C * T * 4
    tb_target = max(1, (1024 * 1024) // max(1, per_sample_bytes))
    TB = _largest_divisor_le(B, tb_target)

    grid = (B // TB, pl.cdiv(HW, T))

    out = pl.pallas_call(
        modified_softmax_kernel,
        out_shape=jax.ShapeDtypeStruct((B, C, HW), x.dtype),
        grid_spec=pltpu.PrefetchScalarGridSpec(
            num_scalar_prefetch=0,
            grid=grid,
            in_specs=[pl.BlockSpec((TB, C, T), lambda b, j: (b, 0, j))],
            out_specs=pl.BlockSpec((TB, C, T), lambda b, j: (b, 0, j)),
        ),
        compiler_params=pltpu.CompilerParams(
            # both axes fully independent -> shard across TensorCores (v7x megacore)
            dimension_semantics=("parallel", "parallel"),
        ),
    )(xf)
    return out.reshape(B, C, H, W)


def _reference(x):
    c = x.shape[1]
    mean = jnp.mean(x, axis=1, keepdims=True)
    var = jnp.sum((x - mean) ** 2, axis=1, keepdims=True) / (c - 1)
    xn = (x - mean) / (jnp.sqrt(var) + 1e-6)
    return jax.nn.softmax(xn * 8.0, axis=1)


if __name__ == "__main__":
    key = jax.random.PRNGKey(0)
    x = jax.random.normal(key, (2, 4, 16, 16), dtype=jnp.float32)

    y = modified_softmax(x)
    y = jax.block_until_ready(y)

    y_ref = _reference(x)
    assert y.shape == x.shape
    assert jnp.allclose(y, y_ref, atol=1e-5, rtol=1e-5), "mismatch vs JAX reference"
    # softmax over channels should sum to 1
    assert jnp.allclose(jnp.sum(y, axis=1), 1.0, atol=1e-5)

    print("KERNEL_OK")
</pallas_src>

<mosaic_0001>
module attributes {stable_mosaic.version = 11 : i64} {
  func.func @modified_softmax_kernel(%arg0: i32, %arg1: i32, %arg2: memref<2x4x256xf32, #tpu.memory_space<vmem>>, %arg3: memref<2x4x256xf32, #tpu.memory_space<vmem>>) attributes {dimension_semantics = [#tpu.dimension_semantics<parallel>, #tpu.dimension_semantics<parallel>], iteration_bounds = array<i64: 1, 1>, scalar_prefetch = 0 : i64, scratch_operands = 0 : i64, tpu.core_type = #tpu.core_type<tc>, window_params = [{transform_indices = @transform_0, window_bounds = array<i64: 2, 4, 256>}, {transform_indices = @transform_1, window_bounds = array<i64: 2, 4, 256>}]} {
    %c0 = arith.constant 0 : index
    %c0_0 = arith.constant 0 : index
    %c0_1 = arith.constant 0 : index
    %0 = vector.load %arg2[%c0, %c0_0, %c0_1] : memref<2x4x256xf32, #tpu.memory_space<vmem>>, vector<2x4x256xf32>
    %cst = arith.constant dense<0.000000e+00> : vector<2x256xf32>
    %1 = vector.multi_reduction <add>, %0, %cst [1] : vector<2x4x256xf32> to vector<2x256xf32>
    %2 = vector.shape_cast %1 : vector<2x256xf32> to vector<2x1x256xf32>
    %cst_2 = arith.constant 4.000000e+00 : f32
    %3 = vector.broadcast %cst_2 : f32 to vector<2x1x256xf32>
    %4 = arith.divf %2, %3 : vector<2x1x256xf32>
    %5 = vector.broadcast %4 : vector<2x1x256xf32> to vector<2x4x256xf32>
    %6 = arith.subf %0, %5 : vector<2x4x256xf32>
    %7 = arith.mulf %6, %6 : vector<2x4x256xf32>
    %cst_3 = arith.constant dense<0.000000e+00> : vector<2x256xf32>
    %8 = vector.multi_reduction <add>, %7, %cst_3 [1] : vector<2x4x256xf32> to vector<2x256xf32>
    %9 = vector.shape_cast %8 : vector<2x256xf32> to vector<2x1x256xf32>
    %cst_4 = arith.constant 0.333333343 : f32
    %10 = vector.broadcast %cst_4 : f32 to vector<2x1x256xf32>
    %11 = arith.mulf %9, %10 : vector<2x1x256xf32>
    %12 = math.sqrt %11 : vector<2x1x256xf32>
    %cst_5 = arith.constant 9.99999997E-7 : f32
    %13 = vector.broadcast %cst_5 : f32 to vector<2x1x256xf32>
    %14 = arith.addf %12, %13 : vector<2x1x256xf32>
    %15 = tpu.reciprocal %14 : vector<2x1x256xf32> -> vector<2x1x256xf32>
    %cst_6 = arith.constant 8.000000e+00 : f32
    %16 = vector.broadcast %cst_6 : f32 to vector<2x1x256xf32>
    %17 = arith.mulf %16, %15 : vector<2x1x256xf32>
    %cst_7 = arith.constant dense<0xFF800000> : vector<2x256xf32>
    %18 = vector.multi_reduction <maximumf>, %0, %cst_7 [1] : vector<2x4x256xf32> to vector<2x256xf32>
    %19 = vector.shape_cast %18 : vector<2x256xf32> to vector<2x1x256xf32>
    %20 = vector.broadcast %19 : vector<2x1x256xf32> to vector<2x4x256xf32>
    %21 = arith.subf %0, %20 : vector<2x4x256xf32>
    %22 = vector.broadcast %17 : vector<2x1x256xf32> to vector<2x4x256xf32>
    %23 = arith.mulf %22, %21 : vector<2x4x256xf32>
    %24 = math.exp %23 : vector<2x4x256xf32>
    %cst_8 = arith.constant dense<0.000000e+00> : vector<2x256xf32>
    %25 = vector.multi_reduction <add>, %24, %cst_8 [1] : vector<2x4x256xf32> to vector<2x256xf32>
    %26 = vector.shape_cast %25 : vector<2x256xf32> to vector<2x1x256xf32>
    %27 = tpu.reciprocal %26 : vector<2x1x256xf32> -> vector<2x1x256xf32>
    %28 = vector.broadcast %27 : vector<2x1x256xf32> to vector<2x4x256xf32>
    %29 = arith.mulf %24, %28 : vector<2x4x256xf32>
    %c0_9 = arith.constant 0 : index
    %c0_10 = arith.constant 0 : index
    %c0_11 = arith.constant 0 : index
    %30 = vector.load %arg3[%c0_9, %c0_10, %c0_11] : memref<2x4x256xf32, #tpu.memory_space<vmem>>, vector<2x4x256xf32>
    tpu.vector_store %arg3[%c0_9, %c0_10, %c0_11], %29 {strides = array<i32>} : memref<2x4x256xf32, #tpu.memory_space<vmem>>, vector<2x4x256xf32>,
    return
  }
  func.func @transform_0(%arg0: i32, %arg1: i32) -> (i32, i32, i32) {
    %c0_i32 = arith.constant 0 : i32
    %c0_i32_0 = arith.constant 0 : i32
    return %arg0, %c0_i32, %arg1 : i32, i32, i32
  }
  func.func @transform_1(%arg0: i32, %arg1: i32) -> (i32, i32, i32) {
    %c0_i32 = arith.constant 0 : i32
    %c0_i32_0 = arith.constant 0 : i32
    return %arg0, %c0_i32, %arg1 : i32, i32, i32
  }
}

</mosaic_0001>

<bundles_post_ra>
// kernel: tpu_custom_call.1
= control target key start
LH: loop header
LB: loop body
LE: loop exit
PB: predicated region body
PF: predicated region fallthrough
CT: control target
= control target key end

     0   :  { %6 = vsyncpa [#allocation3], 0  ;;  %s439_s0 = inlined_call_operand.hbm [shape: f32[2,4,256], index: 0, kind: input, shape index: {}]   ;;  %s440_s1 = inlined_call_operand.hbm [shape: f32[2,4,256], index: 1, kind: output, shape index: {}]  }
   0x1   :  { %7 = vsyncpa [#allocation4], 0  ;;  %s360_s6 = smov [#allocation2]   ;;  %s312_s10 = scalar_lea.hbm %s439_s0, 256 }
   0x2   :  { %s13_s7 = sshll.u32 %s360_s6, 4  ;;  %p313_p0 = scmp.ne.s32.totalorder %s439_s0, %s312_s10  ;;  %s14_s7 = int_to_ptr.vmem [resolvable:$true] %s13_s7 }
   0x3   :  { %p316_p1 = scmp.lt.u32.totalorder %s312_s10, %s439_s0 }
   0x5   :  { %p318_p2 = pnand %p316_p1, %p313_p0 }
   0x7   :  { %321 = shalt.err (!%p318_p2)
}
   0x8   :  { %s322_s15 = scalar_lea.vmem %s14_s7, 256  ;;  %p327_p4 = scmp.lt.s32.totalorder %s14_s7, %s14_s7 }
   0x9   :  { %p323_p3 = scmp.ne.s32.totalorder %s14_s7, %s322_s15  ;;  %p328_p5 = scmp.lt.s32.totalorder %s322_s15, %s322_s15 }
   0xb   :  { %p329_p6 = por %p328_p5, %p327_p4 }
   0xd   :  { %p330_p7 = pnand %p329_p6, %p323_p3 }
   0xf   :  { %333 = shalt.err (!%p330_p7)
}
  0x10   :  { %s361_s16 = smov 128   ;;  %s362_s17 = smov 8  }
  0x11   :  { %19 = dma.hbm_to_vmem [thread:$0]  %s439_s0, 256, %s14_s7, [#allocation3], %s361_s16, %s361_s16, %s362_s17  }
  0x12   :  { %356 = dma.done.wait [#allocation3], 256  }
  0x13   :  { %357 = vsyncadd [#allocation3], 4294967040  ;;  %vm31_vm0 = vcmask 1043456   ;;  %v389_v0 = vld [vmem:[#allocation2] sm:$0xff]  ;;  %v391_v1 = vld [vmem:[#allocation2 + $0x8] sm:$0xff]  ;;  %s363_s0 = smov [#allocation5]  }
  0x14   :  { %v27_v2 = vcombine.high %v389_v0, %v389_v0  ;;  %v32_v3 = vsel %vm31_vm0, %v389_v0, 0.0  ;;  %v28_v4 = vcombine.high %v391_v1, %v391_v1  ;;  %v46_v6 = vsel %vm31_vm0, %v391_v1, 0.0  ;;  %s262_s20 = sshll.u32 %s363_s0, 4  ;;  %s263_s20 = int_to_ptr.vmem [resolvable:$true] %s262_s20 }
  0x15   :  { %v33_v5 = vrot.slane %v32_v3, 4  ;;  %v47_v8 = vrot.slane %v46_v6, 4  ;;  %v155_v44 = vsel %vm31_vm0, %v389_v0, -inf  ;;  %v169_v59 = vsel %vm31_vm0, %v391_v1, -inf  ;;  %s334_s21 = scalar_lea.vmem %s263_s20, 256  ;;  %p339_p9 = scmp.lt.s32.totalorder %s263_s20, %s263_s20 }
  0x16   :  { %v39_v7 = vsel %vm31_vm0, %v27_v2, 0.0  ;;  %v53_v9 = vsel %vm31_vm0, %v28_v4, 0.0  ;;  %v156_v52 = vrot.slane %v155_v44, 4  ;;  %v162_v58 = vsel %vm31_vm0, %v27_v2, -inf  ;;  %p335_p8 = scmp.ne.s32.totalorder %s263_s20, %s334_s21  ;;  %p340_p10 = scmp.lt.s32.totalorder %s334_s21, %s334_s21 }
  0x17   :  { %v34_v10 = vadd.f32 %v33_v5, %v32_v3  ;;  %v40_v11 = vrot.slane %v39_v7, 4  ;;  %v48_v12 = vadd.f32 %v47_v8, %v46_v6  ;;  %v54_v13 = vrot.slane %v53_v9, 4 }
  0x18   :  { %v176_v62 = vsel %vm31_vm0, %v28_v4, -inf  ;;  %v157_v5 = vmax.f32 %v155_v44, %v156_v52  ;;  %v163_v6 = vrot.slane %v162_v58, 4  ;;  %p341_p11 = por %p340_p10, %p339_p9 }
  0x19   :  { %v35_v14 = vrot.slane %v34_v10, 2  ;;  %v41_v15 = vadd.f32 %v40_v11, %v39_v7  ;;  %v49_v16 = vrot.slane %v48_v12, 2  ;;  %v55_v17 = vadd.f32 %v54_v13, %v53_v9 }
  0x1a   :  { %v170_v9 = vrot.slane %v169_v59, 4  ;;  %p342_p12 = pnand %p341_p11, %p335_p8 }
  0x1b   :  { %v36_v18 = vadd.f32 %v35_v14, %v34_v10  ;;  %v42_v19 = vrot.slane %v41_v15, 2  ;;  %v50_v20 = vadd.f32 %v49_v16, %v48_v12  ;;  %v56_v21 = vrot.slane %v55_v17, 2 }
  0x1c   :  { %v177_v12 = vrot.slane %v176_v62, 4  ;;  %v158_v16 = vrot.slane %v157_v5, 2 }
  0x1d   :  { %v37_v22 = vrot.slane %v36_v18, 1  ;;  %v43_v23 = vadd.f32 %v42_v19, %v41_v15  ;;  %v51_v24 = vrot.slane %v50_v20, 1  ;;  %v57_v25 = vadd.f32 %v56_v21, %v55_v17 }
  0x1e   :  { %v164_v17 = vmax.f32 %v162_v58, %v163_v6 }
  0x1f   :  { %v38_v26 = vadd.f32 %v37_v22, %v36_v18  ;;  %v44_v27 = vrot.slane %v43_v23, 1  ;;  %v52_v28 = vadd.f32 %v51_v24, %v50_v20  ;;  %v58_v29 = vrot.slane %v57_v25, 1 }
  0x20   :  { %v171_v20 = vmax.f32 %v169_v59, %v170_v9  ;;  %v178_v22 = vmax.f32 %v176_v62, %v177_v12 }
  0x21   :  { %v45_v30 = vadd.f32 %v44_v27, %v43_v23  ;;  %v61_v31 = vmul.f32 0.25, %v38_v26  ;;  %v59_v32 = vadd.f32 %v58_v29, %v57_v25  ;;  %v63_v33 = vmul.f32 0.25, %v52_v28 }
  0x22   :  { %v159_v26 = vmax.f32 %v157_v5, %v158_v16  ;;  %v165_v27 = vrot.slane %v164_v17, 2  ;;  %v172_v29 = vrot.slane %v171_v20, 2 }
  0x23   :  { %v62_v34 = vmul.f32 0.25, %v45_v30  ;;  %v64_v35 = vmul.f32 0.25, %v59_v32  ;;  %v179_v30 = vrot.slane %v178_v22, 2 }
  0x24   :  { %v166_v32 = vmax.f32 %v164_v17, %v165_v27 }
  0x25   :  { %v69_v36 = vcombine.low %v61_v31, %v62_v34  ;;  %v70_v37 = vcombine.low %v63_v33, %v64_v35  ;;  %v160_v31 = vrot.slane %v159_v26, 1  ;;  %v173_v33 = vmax.f32 %v171_v20, %v172_v29 }
  0x26   :  { %v180_v34 = vmax.f32 %v178_v22, %v179_v30 }
  0x27   :  { %v73_v38 = vsub.f32 %v389_v0, %v69_v36  ;;  %v74_v39 = vsub.f32 %v391_v1, %v70_v37  ;;  %v161_v35 = vmax.f32 %v159_v26, %v160_v31  ;;  %v167_v36 = vrot.slane %v166_v32, 1 }
  0x28   :  { %v174_v37 = vrot.slane %v173_v33, 1 }
  0x29   :  { %v75_v40 = vmul.f32 %v73_v38, %v73_v38  ;;  %v76_v41 = vmul.f32 %v74_v39, %v74_v39 }
  0x2b   :  { %v79_v42 = vcombine.high %v75_v40, %v75_v40  ;;  %v83_v43 = vsel %vm31_vm0, %v75_v40, 0.0  ;;  %v80_v46 = vcombine.high %v76_v41, %v76_v41  ;;  %v97_v47 = vsel %vm31_vm0, %v76_v41, 0.0 }
  0x2c   :  { %v84_v45 = vrot.slane %v83_v43, 4  ;;  %v98_v49 = vrot.slane %v97_v47, 4  ;;  %v181_v40 = vrot.slane %v180_v34, 1 }
  0x2d   :  { %v90_v48 = vsel %vm31_vm0, %v79_v42, 0.0  ;;  %v104_v53 = vsel %vm31_vm0, %v80_v46, 0.0 }
  0x2e   :  { %v85_v50 = vadd.f32 %v84_v45, %v83_v43  ;;  %v91_v51 = vrot.slane %v90_v48, 4  ;;  %v99_v54 = vadd.f32 %v98_v49, %v97_v47  ;;  %v105_v55 = vrot.slane %v104_v53, 4 }
  0x30   :  { %v86_v56 = vrot.slane %v85_v50, 2  ;;  %v92_v57 = vadd.f32 %v91_v51, %v90_v48  ;;  %v100_v60 = vrot.slane %v99_v54, 2  ;;  %v106_v61 = vadd.f32 %v105_v55, %v104_v53 }
  0x32   :  { %v87_v63 = vadd.f32 %v86_v56, %v85_v50  ;;  %v93_v3 = vrot.slane %v92_v57, 2  ;;  %v101_v7 = vadd.f32 %v100_v60, %v99_v54  ;;  %v107_v8 = vrot.slane %v106_v61, 2 }
  0x33   :  { %v168_v56 = vmax.f32 %v166_v32, %v167_v36 }
  0x34   :  { %v88_v10 = vrot.slane %v87_v63, 1  ;;  %v94_v11 = vadd.f32 %v93_v3, %v92_v57  ;;  %v102_v13 = vrot.slane %v101_v7, 1  ;;  %v108_v14 = vadd.f32 %v107_v8, %v106_v61 }
  0x35   :  { %v175_v61 = vmax.f32 %v173_v33, %v174_v37  ;;  %v182_v3 = vmax.f32 %v180_v34, %v181_v40  ;;  %v187_v6 = vcombine.low %v161_v35, %v168_v56 }
  0x36   :  { %v89_v2 = vadd.f32 %v88_v10, %v87_v63  ;;  %v95_v15 = vrot.slane %v94_v11, 1  ;;  %v103_v18 = vadd.f32 %v102_v13, %v101_v7  ;;  %v109_v19 = vrot.slane %v108_v14, 1 }
  0x37   :  { %v188_v7 = vcombine.low %v175_v61, %v182_v3  ;;  %v191_v8 = vsub.f32 %v389_v0, %v187_v6 }
  0x38   :  { %v96_v4 = vadd.f32 %v95_v15, %v94_v11  ;;  %v111_v21 = vmul.f32 0.33333334, %v89_v2  ;;  %v110_v23 = vadd.f32 %v109_v19, %v108_v14  ;;  %v113_v24 = vmul.f32 0.33333334, %v103_v18 }
  0x39   :  { %v192_v9 = vsub.f32 %v391_v1, %v188_v7  ;;  %v195_v13 = vcombine.high %v191_v8, %v191_v8 }
  0x3a   :  { %v112_v25 = vmul.f32 0.33333334, %v96_v4  ;;  %280 = vrsqrt.f32 %v111_v21  ;;  %v114_v28 = vmul.f32 0.33333334, %v110_v23  ;;  %vm117_vm1 = vcmp.eq.f32.partialorder %v111_v21, inf }
  0x3b   :  { %282 = vrsqrt.f32 %v113_v24  ;;  %vm119_vm2 = vcmp.eq.f32.partialorder %v111_v21, 0.0  ;;  %v120_v39 = vand.u32 2147483648, %v111_v21  ;;  %vm131_vm4 = vcmp.eq.f32.partialorder %v113_v24, inf }
  0x3c   :  { %284 = vrsqrt.f32 %v112_v25  ;;  %vm124_vm3 = vcmp.eq.f32.partialorder %v112_v25, inf  ;;  %v134_v43 = vand.u32 2147483648, %v113_v24  ;;  %vm126_vm5 = vcmp.eq.f32.partialorder %v112_v25, 0.0 }
  0x3d   :  { %286 = vrsqrt.f32 %v114_v28  ;;  %v127_v45 = vand.u32 2147483648, %v112_v25  ;;  %vm133_vm6 = vcmp.eq.f32.partialorder %v113_v24, 0.0  ;;  %vm138_vm7 = vcmp.eq.f32.partialorder %v114_v28, inf }
  0x3e   :  { %v141_v50 = vand.u32 2147483648, %v114_v28  ;;  %vm140_vm8 = vcmp.eq.f32.partialorder %v114_v28, 0.0  ;;  %v196_v15 = vcombine.high %v192_v9, %v192_v9 }
  0x44   :  { %v281_v38 = vpop.eup %280 }
  0x45   :  { %v283_v41 = vpop.eup %282  ;;  %v116_v42 = vmul.f32 %v281_v38, %v111_v21 }
  0x46   :  { %v285_v44 = vpop.eup %284  ;;  %v130_v46 = vmul.f32 %v283_v41, %v113_v24 }
  0x47   :  { %v287_v47 = vpop.eup %286  ;;  %v118_v48 = vsel %vm117_vm1, %v111_v21, %v116_v42  ;;  %v123_v49 = vmul.f32 %v285_v44, %v112_v25 }
  0x48   :  { %v121_v51 = vsel %vm119_vm2, %v120_v39, %v118_v48  ;;  %v132_v52 = vsel %vm131_vm4, %v113_v24, %v130_v46  ;;  %v137_v53 = vmul.f32 %v287_v47, %v114_v28 }
  0x49   :  { %v125_v54 = vsel %vm124_vm3, %v112_v25, %v123_v49  ;;  %v143_v55 = vadd.f32 1e-06, %v121_v51  ;;  %v135_v57 = vsel %vm133_vm6, %v134_v43, %v132_v52 }
  0x4a   :  { %v128_v58 = vsel %vm126_vm5, %v127_v45, %v125_v54  ;;  %v139_v59 = vsel %vm138_vm7, %v114_v28, %v137_v53  ;;  %v145_v60 = vadd.f32 1e-06, %v135_v57 }
  0x4b   :  { %v144_v62 = vadd.f32 1e-06, %v128_v58  ;;  %288 = vrcp.f32 %v143_v55  ;;  %v142_v63 = vsel %vm140_vm8, %v141_v50, %v139_v59 }
  0x4c   :  { %v146_v5 = vadd.f32 1e-06, %v142_v63  ;;  %290 = vrcp.f32 %v145_v60 }
  0x4d   :  { %292 = vrcp.f32 %v144_v62 }
  0x4e   :  { %294 = vrcp.f32 %v146_v5 }
  0x55   :  { %v289_v10 = vpop.eup %288 }
  0x56   :  { %v291_v11 = vpop.eup %290  ;;  %v151_v12 = vmul.f32 8.0, %v289_v10 }
  0x57   :  { %v293_v14 = vpop.eup %292  ;;  %v153_v2 = vmul.f32 8.0, %v291_v11 }
  0x58   :  { %v295_v16 = vpop.eup %294  ;;  %v152_v17 = vmul.f32 8.0, %v293_v14  ;;  %v199_v18 = vmul.f32 %v191_v8, %v151_v12 }
  0x59   :  { %v154_v19 = vmul.f32 8.0, %v295_v16  ;;  %v201_v20 = vmul.f32 %v192_v9, %v153_v2 }
  0x5a   :  { %v200_v4 = vmul.f32 %v195_v13, %v152_v17  ;;  %v203_v21 = vmul.f32 1.442695, %v199_v18 }
  0x5b   :  { %v202_v22 = vmul.f32 %v196_v15, %v154_v19  ;;  %v207_v23 = vmul.f32 1.442695, %v201_v20 }
  0x5c   :  { %296 = vpow2.f32 %v203_v21  ;;  %v205_v0 = vmul.f32 1.442695, %v200_v4 }
  0x5d   :  { %298 = vpow2.f32 %v207_v23  ;;  %v209_v1 = vmul.f32 1.442695, %v202_v22 }
  0x5e   :  { %300 = vpow2.f32 %v205_v0 }
  0x5f   :  { %302 = vpow2.f32 %v209_v1 }
  0x66   :  { %v297_v24 = vpop.eup %296 }
  0x67   :  { %v299_v25 = vpop.eup %298  ;;  %v211_v26 = vsel %vm31_vm0, %v297_v24, 0.0 }
  0x68   :  { %v301_v27 = vpop.eup %300  ;;  %v212_v28 = vrot.slane %v211_v26, 4  ;;  %v225_v29 = vsel %vm31_vm0, %v299_v25, 0.0 }
  0x69   :  { %v303_v30 = vpop.eup %302  ;;  %v218_v31 = vsel %vm31_vm0, %v301_v27, 0.0  ;;  %v226_v32 = vrot.slane %v225_v29, 4 }
  0x6a   :  { %v213_v33 = vadd.f32 %v212_v28, %v211_v26  ;;  %v219_v34 = vrot.slane %v218_v31, 4  ;;  %v232_v35 = vsel %vm31_vm0, %v303_v30, 0.0 }
  0x6b   :  { %v227_v36 = vadd.f32 %v226_v32, %v225_v29  ;;  %v233_v37 = vrot.slane %v232_v35, 4 }
  0x6c   :  { %v214_v38 = vrot.slane %v213_v33, 2  ;;  %v220_v39 = vadd.f32 %v219_v34, %v218_v31 }
  0x6d   :  { %v228_v40 = vrot.slane %v227_v36, 2  ;;  %v234_v41 = vadd.f32 %v233_v37, %v232_v35 }
  0x6e   :  { %v215_v42 = vadd.f32 %v214_v38, %v213_v33  ;;  %v221_v43 = vrot.slane %v220_v39, 2 }
  0x6f   :  { %v229_v44 = vadd.f32 %v228_v40, %v227_v36  ;;  %v235_v45 = vrot.slane %v234_v41, 2 }
  0x70   :  { %v216_v46 = vrot.slane %v215_v42, 1  ;;  %v222_v47 = vadd.f32 %v221_v43, %v220_v39 }
  0x71   :  { %v230_v48 = vrot.slane %v229_v44, 1  ;;  %v236_v49 = vadd.f32 %v235_v45, %v234_v41 }
  0x72   :  { %v217_v50 = vadd.f32 %v216_v46, %v215_v42  ;;  %v223_v51 = vrot.slane %v222_v47, 1 }
  0x73   :  { %v231_v52 = vadd.f32 %v230_v48, %v229_v44  ;;  %v237_v53 = vrot.slane %v236_v49, 1 }
  0x74   :  { %v224_v54 = vadd.f32 %v223_v51, %v222_v47  ;;  %304 = vrcp.f32 %v217_v50 }
  0x75   :  { %v238_v55 = vadd.f32 %v237_v53, %v236_v49  ;;  %306 = vrcp.f32 %v231_v52 }
  0x76   :  { %308 = vrcp.f32 %v224_v54 }
  0x77   :  { %310 = vrcp.f32 %v238_v55 }
  0x7e   :  { %v305_v56 = vpop.eup %304 }
  0x7f   :  { %v307_v57 = vpop.eup %306  ;;  %v243_v58 = vmul.f32 %v305_v56, %v297_v24 }
  0x80   :  { %v309_v59 = vpop.eup %308  ;;  %v245_v60 = vmul.f32 %v307_v57, %v299_v25 }
  0x81   :  { %v311_v61 = vpop.eup %310  ;;  %v244_v62 = vmul.f32 %v309_v59, %v301_v27 }
  0x82   :  { %v246_v63 = vmul.f32 %v311_v61, %v303_v30 }
  0x83   :  { %v251_v3 = vcombine.low %v243_v58, %v244_v62 }
  0x84   :  { %v252_v5 = vcombine.low %v245_v60, %v246_v63 }
  0x85   :  { %255 = vst [vmem:[#allocation5] sm:$0xff] %v251_v3 }
  0x86   :  { %256 = vst [vmem:[#allocation5 + $0x8] sm:$0xff] %v252_v5 }
  0x87   :  { %345 = shalt.err (!%p342_p12)
}
  0x88   :  { %s346_s24 = scalar_lea.hbm %s440_s1, 256 }
  0x89   :  { %p347_p13 = scmp.ne.s32.totalorder %s440_s1, %s346_s24  ;;  %p350_p0 = scmp.lt.u32.totalorder %s346_s24, %s440_s1 }
  0x8b   :  { %p352_p1 = pnand %p350_p0, %p347_p13 }
  0x8d   :  { %355 = shalt.err (!%p352_p1)
}
  0x8e   :  { %268 = dma.vmem_to_hbm [thread:$0]  %s263_s20, 256, %s440_s1, [#allocation4], %s361_s16, %s361_s16, %s362_s17  }
  0x8f   :  { %358 = dma.done.wait [#allocation4], 256  }
  0x90   :  { %359 = vsyncadd [#allocation4], 4294967040 }
  0x91   :  { %272 = vsyncpa [#allocation3], 1 }
  0x92   :  { %273 = vsyncpa [#allocation4], 1 }

</bundles_post_ra>
